<compile_context>
chip_gen: v7x
topology: tpu7x:2x2x1
jax: 0.10.0
libtpu: 0.0.40
codegen_flags: <defaults>
</compile_context>

<pallas_src>
from functools import partial

import numpy as np
import jax
import jax.numpy as jnp
from jax.experimental import pallas as pl
from jax.experimental.pallas import tpu as pltpu


# --------------------------------------------------------------------------- #
# Pallas kernel: out = LeakyReLU( scale * (W @ patches) + bias )
# --------------------------------------------------------------------------- #
def _conv_kernel(x_ref, w_ref, s_ref, b_ref, o_ref, *, act):
    x = x_ref[0, 0]                 # (K, TP)      lane-dense patches tile
    w = w_ref[0]                    # (C2g, K)     per-group weight matrix
    acc = jnp.dot(w, x, preferred_element_type=jnp.float32)   # MXU, (C2g, TP)
    y = acc * s_ref[0] + b_ref[0]   # fused eval-mode BN (per-channel affine)
    if act:                         # static flag -> LeakyReLU(0.1) or identity
        y = jnp.where(y > 0, y, 0.1 * y)
    o_ref[0, 0] = y.astype(o_ref.dtype)


def _choose_spatial_tile(P, max_tile=2048):
    """Lane-dense spatial tiling of the flattened H_out*W_out dimension.

    Use the full extent when small or not 128-divisible (BlockSpec full-dim
    exemption); otherwise the largest 128-multiple divisor <= max_tile, keeping
    the double-buffered VMEM footprint bounded (v7x: 64 MiB) while staying well
    above ~512 lanes per store stream (v5e advice).
    """
    if P <= max_tile or P % 128 != 0:
        return P
    best = 128
    t = 128
    while t <= max_tile:
        if P % t == 0:
            best = t
        t += 128
    return best


# --------------------------------------------------------------------------- #
# Functional fused forward
# --------------------------------------------------------------------------- #
@partial(jax.jit, static_argnames=("k", "s", "g", "act"))
def conv_bn_act(x, w, gamma, beta, mean, var, eps, *, k, s, g, act):
    N, C1, H, W = x.shape
    C2 = w.shape[0]
    p = k // 2
    H_out = (H + 2 * p - k) // s + 1
    W_out = (W + 2 * p - k) // s + 1
    P = H_out * W_out
    C1g = C1 // g
    C2g = C2 // g
    K = C1g * k * k

    # ---- patch extraction (plain JAX; pure reshape for the default k=1, s=1) ----
    if k == 1 and s == 1:
        patches = x.reshape(N, C1, P)
    else:
        xpad = jnp.pad(x, ((0, 0), (0, 0), (p, p), (p, p)))
        taps = []
        for kh in range(k):
            for kw in range(k):
                taps.append(
                    xpad[:, :,
                         kh:kh + s * (H_out - 1) + 1:s,
                         kw:kw + s * (W_out - 1) + 1:s])
        # ordering: channel slow, (kh, kw) fast  -> matches w.reshape(C2, C1g*k*k)
        patches = jnp.stack(taps, axis=2).reshape(N, C1 * k * k, P)
    patches = patches.reshape(N, g, K, P)

    w_mat = w.reshape(g, C2g, K)

    # Fold eval-mode BatchNorm into a per-output-channel affine.
    inv = gamma / jnp.sqrt(var + eps)
    scale = inv.reshape(g, C2g, 1).astype(jnp.float32)
    bias = (beta - mean * inv).reshape(g, C2g, 1).astype(jnp.float32)

    TP = _choose_spatial_tile(P)
    n_pt = P // TP

    out = pl.pallas_call(
        partial(_conv_kernel, act=act),
        grid=(N, g, n_pt),
        in_specs=[
            pl.BlockSpec((1, 1, K, TP), lambda n, gi, pi: (n, gi, 0, pi)),
            pl.BlockSpec((1, C2g, K), lambda n, gi, pi: (gi, 0, 0)),
            pl.BlockSpec((1, C2g, 1), lambda n, gi, pi: (gi, 0, 0)),
            pl.BlockSpec((1, C2g, 1), lambda n, gi, pi: (gi, 0, 0)),
        ],
        out_specs=pl.BlockSpec((1, 1, C2g, TP), lambda n, gi, pi: (n, gi, 0, pi)),
        out_shape=jax.ShapeDtypeStruct((N, g, C2g, P), x.dtype),
        compiler_params=pltpu.CompilerParams(
            dimension_semantics=("parallel", "parallel", "parallel")),
    )(patches, w_mat, scale, bias)

    return out.reshape(N, C2, H_out, W_out)


# --------------------------------------------------------------------------- #
# Module mirroring the PyTorch Conv
# --------------------------------------------------------------------------- #
class Conv:
    """JAX/Pallas mirror of the YoloV5 PyTorch `Conv` module."""

    def __init__(self, c1, c2, k=1, s=1, g=1, act=True, width_multiple=1.0,
                 *, key=None, dtype=jnp.float32):
        c1 = c1 * width_multiple
        c2 = c2 * width_multiple
        c1 = int(round(c1, 1))
        c2 = int(round(c2, 1))
        assert c1 % g == 0 and c2 % g == 0
        self.c1, self.c2 = c1, c2
        self.k, self.s, self.g = int(k), int(s), int(g)
        self.act = bool(act)

        if key is None:
            key = jax.random.PRNGKey(0)
        fan_in = (c1 // g) * self.k * self.k
        self.weight = jax.random.normal(
            key, (c2, c1 // g, self.k, self.k), dtype) / np.sqrt(fan_in)

        # BatchNorm2d parameters / running stats (fresh eval-mode defaults).
        self.bn_gamma = jnp.ones((c2,), dtype)
        self.bn_beta = jnp.zeros((c2,), dtype)
        self.bn_mean = jnp.zeros((c2,), dtype)
        self.bn_var = jnp.ones((c2,), dtype)
        self.bn_eps = 1e-5

    def __call__(self, x):
        return conv_bn_act(x, self.weight, self.bn_gamma, self.bn_beta,
                           self.bn_mean, self.bn_var, self.bn_eps,
                           k=self.k, s=self.s, g=self.g, act=self.act)

    def fuseforward(self, x):
        c2 = self.c2
        dt = self.weight.dtype
        return conv_bn_act(x, self.weight,
                           jnp.ones((c2,), dt), jnp.zeros((c2,), dt),
                           jnp.zeros((c2,), dt), jnp.ones((c2,), dt), 0.0,
                           k=self.k, s=self.s, g=self.g, act=self.act)


# --------------------------------------------------------------------------- #
# Pure-JAX reference (for correctness check only)
# --------------------------------------------------------------------------- #
def _reference_conv_bn_act(x, w, gamma, beta, mean, var, eps, *, k, s, g, act):
    p = k // 2
    y = jax.lax.conv_general_dilated(
        x, w, window_strides=(s, s), padding=[(p, p), (p, p)],
        dimension_numbers=("NCHW", "OIHW", "NCHW"), feature_group_count=g)
    inv = gamma / jnp.sqrt(var + eps)
    y = y * inv[None, :, None, None] + (beta - mean * inv)[None, :, None, None]
    if act:
        y = jnp.where(y > 0, y, 0.1 * y)
    return y


if __name__ == "__main__":
    root = jax.random.PRNGKey(0)
    kx, kw1, kw2, kw3, kb = jax.random.split(root, 5)

    N, C1, H, W = 2, 4, 16, 16
    x = jax.random.normal(kx, (N, C1, H, W), dtype=jnp.float32)

    def randomize_bn(m, key):
        kg, kbt, km, kv = jax.random.split(key, 4)
        c2 = m.c2
        m.bn_gamma = jax.random.uniform(kg, (c2,), jnp.float32, 0.5, 1.5)
        m.bn_beta = 0.1 * jax.random.normal(kbt, (c2,), jnp.float32)
        m.bn_mean = 0.1 * jax.random.normal(km, (c2,), jnp.float32)
        m.bn_var = jax.random.uniform(kv, (c2,), jnp.float32, 0.5, 1.5)

    tests = [
        (Conv(4, 8, k=1, s=1, g=1, act=True, key=kw1), (N, 8, 16, 16)),   # default 1x1
        (Conv(4, 8, k=3, s=2, g=1, act=True, key=kw2), (N, 8, 8, 8)),     # 3x3 stride-2
        (Conv(4, 8, k=3, s=1, g=2, act=False, key=kw3), (N, 8, 16, 16)),  # grouped, no act
    ]
    bn_keys = jax.random.split(kb, len(tests))

    for (m, expect_shape), key in zip(tests, bn_keys):
        randomize_bn(m, key)
        out = jax.block_until_ready(m(x))
        ref = _reference_conv_bn_act(
            x, m.weight, m.bn_gamma, m.bn_beta, m.bn_mean, m.bn_var, m.bn_eps,
            k=m.k, s=m.s, g=m.g, act=m.act)
        assert out.shape == expect_shape, (out.shape, expect_shape)
        assert out.dtype == x.dtype
        np.testing.assert_allclose(np.asarray(out), np.asarray(ref),
                                   rtol=2e-2, atol=2e-2)

    print("KERNEL_OK")
</pallas_src>

<mosaic_0001>
module attributes {stable_mosaic.version = 11 : i64} {
  func.func @_conv_kernel(%arg0: i32, %arg1: i32, %arg2: i32, %arg3: memref<1x1x4x256xf32, #tpu.memory_space<vmem>>, %arg4: memref<1x8x4xf32, #tpu.memory_space<vmem>>, %arg5: memref<1x8x1xf32, #tpu.memory_space<vmem>>, %arg6: memref<1x8x1xf32, #tpu.memory_space<vmem>>, %arg7: memref<1x1x8x256xf32, #tpu.memory_space<vmem>>) attributes {dimension_semantics = [#tpu.dimension_semantics<parallel>, #tpu.dimension_semantics<parallel>, #tpu.dimension_semantics<parallel>], iteration_bounds = array<i64: 2, 1, 1>, scalar_prefetch = 0 : i64, scratch_operands = 0 : i64, tpu.core_type = #tpu.core_type<tc>, window_params = [{transform_indices = @transform_0, window_bounds = array<i64: 1, 1, 4, 256>}, {transform_indices = @transform_1, window_bounds = array<i64: 1, 8, 4>}, {transform_indices = @transform_2, window_bounds = array<i64: 1, 8, 1>}, {transform_indices = @transform_3, window_bounds = array<i64: 1, 8, 1>}, {transform_indices = @transform_4, window_bounds = array<i64: 1, 1, 8, 256>}]} {
    %c0 = arith.constant 0 : index
    %c0_0 = arith.constant 0 : index
    %c0_1 = arith.constant 0 : index
    %c0_2 = arith.constant 0 : index
    %0 = vector.load %arg3[%c0, %c0_0, %c0_1, %c0_2] : memref<1x1x4x256xf32, #tpu.memory_space<vmem>>, vector<1x1x4x256xf32>
    %1 = vector.shape_cast %0 : vector<1x1x4x256xf32> to vector<4x256xf32>
    %c0_3 = arith.constant 0 : index
    %c0_4 = arith.constant 0 : index
    %c0_5 = arith.constant 0 : index
    %2 = vector.load %arg4[%c0_3, %c0_4, %c0_5] : memref<1x8x4xf32, #tpu.memory_space<vmem>>, vector<1x8x4xf32>
    %3 = vector.shape_cast %2 : vector<1x8x4xf32> to vector<8x4xf32>
    %cst = arith.constant dense<0.000000e+00> : vector<8x256xf32>
    %4 = tpu.matmul %3, %1, %cst {dimension_numbers = #tpu.dot_dimension_numbers<[1], [0], [0], [1], [0, 0, 1, 1], [], []>} : vector<8x4xf32>, vector<4x256xf32>, vector<8x256xf32> -> vector<8x256xf32>
    %c0_6 = arith.constant 0 : index
    %c0_7 = arith.constant 0 : index
    %c0_8 = arith.constant 0 : index
    %5 = vector.load %arg5[%c0_6, %c0_7, %c0_8] : memref<1x8x1xf32, #tpu.memory_space<vmem>>, vector<1x8x1xf32>
    %6 = vector.shape_cast %5 : vector<1x8x1xf32> to vector<8x1xf32>
    %7 = vector.broadcast %6 : vector<8x1xf32> to vector<8x256xf32>
    %8 = arith.mulf %4, %7 : vector<8x256xf32>
    %c0_9 = arith.constant 0 : index
    %c0_10 = arith.constant 0 : index
    %c0_11 = arith.constant 0 : index
    %9 = vector.load %arg6[%c0_9, %c0_10, %c0_11] : memref<1x8x1xf32, #tpu.memory_space<vmem>>, vector<1x8x1xf32>
    %10 = vector.shape_cast %9 : vector<1x8x1xf32> to vector<8x1xf32>
    %11 = vector.broadcast %10 : vector<8x1xf32> to vector<8x256xf32>
    %12 = arith.addf %8, %11 : vector<8x256xf32>
    %cst_12 = arith.constant 0.000000e+00 : f32
    %13 = vector.broadcast %cst_12 : f32 to vector<8x256xf32>
    %14 = arith.cmpf ogt, %12, %13 : vector<8x256xf32>
    %cst_13 = arith.constant 1.000000e-01 : f32
    %15 = vector.broadcast %cst_13 : f32 to vector<8x256xf32>
    %16 = arith.mulf %15, %12 : vector<8x256xf32>
    %17 = arith.select %14, %12, %16 : vector<8x256xi1>, vector<8x256xf32>
    %c0_14 = arith.constant 0 : index
    %c0_15 = arith.constant 0 : index
    %c0_16 = arith.constant 0 : index
    %c0_17 = arith.constant 0 : index
    %18 = vector.load %arg7[%c0_14, %c0_15, %c0_16, %c0_17] : memref<1x1x8x256xf32, #tpu.memory_space<vmem>>, vector<1x1x8x256xf32>
    %19 = vector.shape_cast %18 : vector<1x1x8x256xf32> to vector<8x256xf32>
    %20 = vector.shape_cast %17 : vector<8x256xf32> to vector<1x1x8x256xf32>
    tpu.vector_store %arg7[%c0_14, %c0_15, %c0_16, %c0_17], %20 {strides = array<i32>} : memref<1x1x8x256xf32, #tpu.memory_space<vmem>>, vector<1x1x8x256xf32>,
    return
  }
  func.func @transform_0(%arg0: i32, %arg1: i32, %arg2: i32) -> (i32, i32, i32, i32) {
    %c0_i32 = arith.constant 0 : i32
    %c0_i32_0 = arith.constant 0 : i32
    return %arg0, %arg1, %c0_i32, %arg2 : i32, i32, i32, i32
  }
  func.func @transform_1(%arg0: i32, %arg1: i32, %arg2: i32) -> (i32, i32, i32) {
    %c0_i32 = arith.constant 0 : i32
    %c0_i32_0 = arith.constant 0 : i32
    %c0_i32_1 = arith.constant 0 : i32
    return %arg1, %c0_i32, %c0_i32_0 : i32, i32, i32
  }
  func.func @transform_2(%arg0: i32, %arg1: i32, %arg2: i32) -> (i32, i32, i32) {
    %c0_i32 = arith.constant 0 : i32
    %c0_i32_0 = arith.constant 0 : i32
    %c0_i32_1 = arith.constant 0 : i32
    return %arg1, %c0_i32, %c0_i32_0 : i32, i32, i32
  }
  func.func @transform_3(%arg0: i32, %arg1: i32, %arg2: i32) -> (i32, i32, i32) {
    %c0_i32 = arith.constant 0 : i32
    %c0_i32_0 = arith.constant 0 : i32
    %c0_i32_1 = arith.constant 0 : i32
    return %arg1, %c0_i32, %c0_i32_0 : i32, i32, i32
  }
  func.func @transform_4(%arg0: i32, %arg1: i32, %arg2: i32) -> (i32, i32, i32, i32) {
    %c0_i32 = arith.constant 0 : i32
    %c0_i32_0 = arith.constant 0 : i32
    return %arg0, %arg1, %c0_i32, %arg2 : i32, i32, i32, i32
  }
}

</mosaic_0001>

<bundles_post_ra>
// kernel: conv_bn_act.1
= control target key start
LH: loop header
LB: loop body
LE: loop exit
PB: predicated region body
PF: predicated region fallthrough
CT: control target
= control target key end

     0   :  { %s682_s15 = smov 0   ;;  %s684_s16 = smov 0   ;;  %s724_s0 = inlined_call_operand.vmem [shape: f32[2,1,4,256], index: 0, kind: input, shape index: {}]   ;;  %s725_s1 = inlined_call_operand.vmem [shape: f32[1,8,4], index: 1, kind: input, shape index: {}]   ;;  %s726_s2 = inlined_call_operand.vmem [shape: f32[1,8,1], index: 2, kind: input, shape index: {}]   ;;  %s727_s3 = inlined_call_operand.vmem [shape: f32[1,8,1], index: 3, kind: input, shape index: {}]   ;;  %s728_s4 = inlined_call_operand.vmem [shape: f32[2,1,8,256], index: 4, kind: output, shape index: {}]  }
   0x1   :  { %s686_s17 = smov 0  }
   0x2 LB: > { %s33_s18 = sadd.s32 1, %s649_s16  ;;  %p591_p0 = scmp.ge.s32.totalorder %s653_s17, 1  ;;  %s653_s17 = sphi %s686_s17, %s14_s17   ;;  %s649_s16 = sphi %s684_s16, %s730_s16   ;;  %s645_s15 = sphi %s682_s15, %s729_s15  }
   0x3   : > { %p35_p1 = scmp.ge.s32.totalorder %s33_s18, 2  ;;  %p225_p2 = scmp.lt.s32.totalorder %s653_s17, 3 }
   0x5   : > { %s732_s18 = smov (%p35_p1, %s33_s18), 0  ;;  %p226_p3 = pnand %p591_p0, %p225_p2 }
   0x6   : > { %p280_p4 = scmp.lt.s32.totalorder (!%p226_p3), %s645_s15, 1  ;;  %v655_v0 = vmov (!%p226_p3), 0.0   ;;  %v656_v1 = vmov (!%p226_p3), 0   ;;  %v403_v2 = vld [vmem:[%s726_s2] sm:$0xff] (!%p226_p3)  ;;  %vm327_vm0 = vcmask (!%p226_p3), 1043456   ;;  %vm323_vm1 = vcmask (!%p226_p3), 31744  }
   0x7   : > { %229 = sbr.rel (%p226_p3) target bundleno = 243 (0xf3), region = 36  ;;  %396 = vmatprep.mubr.f32.mxu0 (!%p226_p3), %v655_v0  ;;  %629 = vset.pattern.permute.xlu0 (!%p226_p3), %v656_v1  ;;  %v411_v3 = vld [vmem:[%s727_s3] sm:$0xff] (!%p226_p3) }
   0x8   : > { %406 = vperm.xlu0 (!%p226_p3), %629, %v403_v2   ;;  %v320_v6 = vld [vmem:[%s725_s1] sm:$0xff] (!%p226_p3) }
   0xc   : > { %414 = vperm.xlu0 (!%p226_p3), %629, %v411_v3  }
   0xe   : > { %s734_s15 = smov (!%p280_p4, %s645_s15), 1 }
   0xf   : > { %s601_s23 = sshll.u32 %s734_s15, 3  ;;  %s602_s29 = sshll.u32 %s734_s15, 4 }
  0x10   : > { %s291_s26 = scalar_lea.vmem %s724_s0, %s601_s23  ;;  %s317_s6 = scalar_lea.vmem %s728_s4, %s602_s29 }
  0x11   : > { %v319_v4 = vld [vmem:[%s291_s26] sm:$0xff] }
  0x12   : > { %v322_v5 = vcombine.high %v319_v4, %v319_v4 }
  0x14   : > { %596 = vmatprep.subr.msk.mxu0 %vm327_vm0, %v322_v5 }
  0x15   : > { %597 = vmatpush1.msk.msra.mxu0 %vm327_vm0, %v319_v4 }
  0x16   : > { %598 = vmatmul.mubr.msk.f32.vlgmr.msra.gmra.mrb[0].mxu0 %vm323_vm1, %v320_v6 }
  0x87   : > { %v407_v7 = vpop.permute.xlu0 %406 }
  0x8b   : > { %v415_v11 = vpop.permute.xlu0 %414 }
  0xe9   : > { %v398_v8 = vpop.f32.mrb[0].mxu0 }
  0xea   : > { %v409_v9 = vmul.f32 %v407_v7, %v398_v8  ;;  %v400_v10 = vpop.f32.mrb[1].mxu0 }
  0xeb   : > { %v410_v12 = vmul.f32 %v407_v7, %v400_v10 }
  0xec   : > { %v417_v13 = vadd.f32 %v415_v11, %v409_v9 }
  0xed   : > { %v418_v14 = vadd.f32 %v415_v11, %v410_v12 }
  0xee   : > { %vm419_vm2 = vcmp.gt.f32.partialorder %v417_v13, 0.0  ;;  %v421_v15 = vmul.f32 0.1, %v417_v13 }
  0xef   : > { %vm420_vm3 = vcmp.gt.f32.partialorder %v418_v14, 0.0  ;;  %v422_v16 = vmul.f32 0.1, %v418_v14 }
  0xf0   : > { %v423_v17 = vsel %vm419_vm2, %v417_v13, %v421_v15 }
  0xf1   : > { %425 = vst [vmem:[%s317_s6] sm:$0xff] %v423_v17  ;;  %v424_v18 = vsel %vm420_vm3, %v418_v14, %v422_v16 }
  0xf2   : > { %426 = vst [vmem:[%s317_s6 + $0x8] sm:$0xff] %v424_v18 }
  0xf3 PF: > { %s14_s17 = sadd.s32 1, %s653_s17   ;;  %s729_s15 = smov %s649_s16 }
  0xf4   : > { %p11_p5 = scmp.ge.s32.totalorder %s14_s17, 4   ;;  %s730_s16 = smov %s732_s18 }
  0xf6   :  { %13 = sbr.rel (!%p11_p5) target bundleno = 2 (0x2), region = 75 }

</bundles_post_ra>
